<compile_context>
chip_gen: v7x
topology: tpu7x:2x2x1
jax: 0.10.0
libtpu: 0.0.40
codegen_flags: <defaults>
</compile_context>

<pallas_src>
import numpy as np
import jax
import jax.numpy as jnp
from jax.experimental import pallas as pl
from jax.experimental.pallas import tpu as pltpu

# Atom selection from the reference module.
_SEL = np.array([0, 4, 5, 6, 8, 10, 14, 15, 16, 18], dtype=np.int32)
# Strict lower-triangle indices in row-major order (matches
# torch.tril(..., -1).flatten() + nonzero when all pair distances are > 0).
_TRI_I = np.array([i for i in range(10) for j in range(i)], dtype=np.int32)
_TRI_J = np.array([j for i in range(10) for j in range(i)], dtype=np.int32)

_LEAKY_SLOPE = 0.01    # nn.LeakyReLU() default negative_slope
_LANES = 128           # padded feature / hidden width (45 -> 128, 100 -> 128)
_OUT_LANES = 8         # padded output width (1 -> 8)
_COORD_LANES = 32      # 10 atoms * 3 coords, padded 30 -> 32
_DEFAULT_TILE_M = 2048


def _round_up(x, m):
    return ((x + m - 1) // m) * m


def _choose_tile_m(n, tile_m):
    n8 = _round_up(max(n, 1), 8)
    tile_m = _round_up(max(8, min(tile_m, n8)), 8)
    # Keep >= 2 grid steps when the batch allows, so the "parallel" axis can
    # be split across both TensorCores (v7x megacore) and the coord/output DMA
    # is double-buffer pipelined against compute.
    if n8 > 8 and (n8 + tile_m - 1) // tile_m < 2:
        tile_m = _round_up((n8 + 1) // 2, 8)
    return tile_m


def _make_selection_mat():
    """(32, 384) selection matrix.

    Column d*128 + k holds the axis-d difference of pair k (k < 45):
    +1 at row 3*a + d and -1 at row 3*b + d for pair k = (a, b).
    Columns k >= 45 within each 128-lane block are all-zero, so padded
    feature lanes stay exactly 0.
    """
    s = np.zeros((_COORD_LANES, 3 * _LANES), dtype=np.float32)
    for k in range(_TRI_I.shape[0]):
        a, b = int(_TRI_I[k]), int(_TRI_J[k])
        for d in range(3):
            s[3 * a + d, d * _LANES + k] += 1.0
            s[3 * b + d, d * _LANES + k] -= 1.0
    return jnp.asarray(s)


def _predict_kernel(coords_ref, sel_ref,
                    w1_ref, b1_ref, w2_ref, b2_ref, w3_ref, b3_ref,
                    w4_ref, b4_ref, w5_ref, b5_ref, out_ref):
    c = coords_ref[...]                                        # (TILE_M, 32) f32

    # Fused pairwise-distance features: a single f32 selection matmul (K=32)
    # produces per-axis differences for all 45 pairs at lane offsets
    # 0 / 128 / 256; square + sum + sqrt run on the VPU.  Padded feature lanes
    # (>= 45) stay exactly 0.
    d = jnp.dot(c, sel_ref[...], preferred_element_type=jnp.float32)
    dx = d[:, :_LANES]
    dy = d[:, _LANES:2 * _LANES]
    dz = d[:, 2 * _LANES:]
    x = jnp.sqrt(dx * dx + dy * dy + dz * dz)                  # (TILE_M, 128) f32

    def dense(h, w_ref, b_ref):
        # bf16 x bf16 MXU matmul with f32 accumulation; bias add in f32.
        return jnp.dot(h.astype(jnp.bfloat16), w_ref[...],
                       preferred_element_type=jnp.float32) + b_ref[...]

    def leaky(h):
        return jnp.where(h >= 0, h, _LEAKY_SLOPE * h)          # leaky(0) == 0

    h = leaky(dense(x, w1_ref, b1_ref))
    h = leaky(dense(h, w2_ref, b2_ref))
    h = leaky(dense(h, w3_ref, b3_ref))
    h = leaky(dense(h, w4_ref, b4_ref))
    out_ref[...] = dense(h, w5_ref, b5_ref)                    # (TILE_M, 8) f32


def _pad_params(params):
    """Zero-pad logical PyTorch shapes; weights -> bf16, biases stay f32."""
    w1, b1, w2, b2, w3, b3, w4, b4, w5, b5 = params

    def pad_w(w, cols):
        w = w.astype(jnp.float32)
        w = jnp.pad(w, ((0, _LANES - w.shape[0]), (0, cols - w.shape[1])))
        return w.astype(jnp.bfloat16)

    def pad_b(b, cols):
        b = b.astype(jnp.float32).reshape(1, -1)
        return jnp.pad(b, ((0, 0), (0, cols - b.shape[1])))

    return (pad_w(w1, _LANES), pad_b(b1, _LANES),
            pad_w(w2, _LANES), pad_b(b2, _LANES),
            pad_w(w3, _LANES), pad_b(b3, _LANES),
            pad_w(w4, _LANES), pad_b(b4, _LANES),
            pad_w(w5, _OUT_LANES), pad_b(b5, _OUT_LANES))


def predict_net_forward(positions, velos, params, *, tile_m=_DEFAULT_TILE_M):
    """Equivalent of PredictNet.forward(positions, velos).

    Note: at tiny batches (N ~ 8, one timestep per call) the call is dominated
    by launch + weight-DMA cost; batch multiple timesteps / configurations
    into a single call to amortize it.
    """
    del velos  # velos is unused in the reference forward pass.

    n = positions.shape[0]
    tile_m = _choose_tile_m(n, tile_m)
    n_pad = _round_up(n, tile_m)

    # --- glue: static atom gather + lane-friendly coordinate layout ---
    # TODO(synk): torch.nonzero is data-dependent; the static strict
    # lower-triangle indexing is identical whenever all pair distances > 0.
    pos_sel = positions[:, _SEL, :].astype(jnp.float32)        # (N, 10, 3)
    coords = pos_sel.reshape(n, 30)
    coords = jnp.pad(coords, ((0, n_pad - n), (0, _COORD_LANES - 30)))

    sel = _make_selection_mat()
    padded = _pad_params(params)

    grid = (n_pad // tile_m,)
    coord_spec = pl.BlockSpec((tile_m, _COORD_LANES), lambda i: (i, 0))
    sel_spec = pl.BlockSpec((_COORD_LANES, 3 * _LANES), lambda i: (0, 0))
    w_spec = pl.BlockSpec((_LANES, _LANES), lambda i: (0, 0))
    b_spec = pl.BlockSpec((1, _LANES), lambda i: (0, 0))
    w5_spec = pl.BlockSpec((_LANES, _OUT_LANES), lambda i: (0, 0))
    b5_spec = pl.BlockSpec((1, _OUT_LANES), lambda i: (0, 0))
    out_spec = pl.BlockSpec((tile_m, _OUT_LANES), lambda i: (i, 0))

    in_specs = [coord_spec, sel_spec]
    in_specs += [w_spec, b_spec] * 4
    in_specs += [w5_spec, b5_spec]

    out = pl.pallas_call(
        _predict_kernel,
        out_shape=jax.ShapeDtypeStruct((n_pad, _OUT_LANES), jnp.float32),
        grid=grid,
        in_specs=in_specs,
        out_specs=out_spec,
        compiler_params=pltpu.CompilerParams(
            dimension_semantics=("parallel",)),
    )(coords, sel, *padded)

    return out[:n, :1]


def init_params(key):
    """Deterministic PyTorch-style (uniform +-1/sqrt(fan_in)) init."""
    dims = [(45, 100), (100, 100), (100, 100), (100, 100), (100, 1)]
    params = []
    for i, (fi, fo) in enumerate(dims):
        kw, kb = jax.random.split(jax.random.fold_in(key, i))
        bound = 1.0 / np.sqrt(fi)
        w = jax.random.uniform(kw, (fi, fo), jnp.float32, -bound, bound)
        b = jax.random.uniform(kb, (1, fo), jnp.float32, -bound, bound)
        params += [w, b]
    return tuple(params)


def _reference_forward(positions, params):
    """Pure-JAX f32 reference (same math, no Pallas)."""
    pos = positions[:, _SEL, :].astype(jnp.float32)
    diff = pos[:, :, None, :] - pos[:, None, :, :]
    d2 = jnp.sum(diff * diff, axis=-1)
    feat = jnp.sqrt(d2[:, _TRI_I, _TRI_J])
    w1, b1, w2, b2, w3, b3, w4, b4, w5, b5 = params

    def leaky(h):
        return jnp.where(h >= 0, h, _LEAKY_SLOPE * h)

    h = leaky(feat @ w1 + b1)
    h = leaky(h @ w2 + b2)
    h = leaky(h @ w3 + b3)
    h = leaky(h @ w4 + b4)
    return h @ w5 + b5


if __name__ == "__main__":
    key = jax.random.PRNGKey(0)
    kp, kv = jax.random.split(key)
    # batch=8, 19 particles (indices up to 18 are used), 3D coordinates.
    positions = jax.random.normal(kp, (8, 19, 3), dtype=jnp.float32)
    velos = jax.random.normal(kv, (8, 19, 3), dtype=jnp.float32)
    params = init_params(jax.random.PRNGKey(1))

    fwd = jax.jit(predict_net_forward)
    out = jax.block_until_ready(fwd(positions, velos, params))
    assert out.shape == (8, 1) and out.dtype == jnp.float32
    assert bool(jnp.all(jnp.isfinite(out)))

    # Sanity check vs pure-JAX f32 reference (loose tol: bf16 MXU matmuls).
    ref = _reference_forward(positions, params)
    assert bool(jnp.allclose(out, ref, rtol=5e-2, atol=5e-2)), (
        float(jnp.max(jnp.abs(out - ref))))

    print("KERNEL_OK")
</pallas_src>

<mosaic_0001>
module attributes {stable_mosaic.version = 11 : i64} {
  func.func @_predict_kernel(%arg0: i32, %arg1: memref<8x32xf32, #tpu.memory_space<vmem>>, %arg2: memref<32x384xf32, #tpu.memory_space<vmem>>, %arg3: memref<128x128xbf16, #tpu.memory_space<vmem>>, %arg4: memref<1x128xf32, #tpu.memory_space<vmem>>, %arg5: memref<128x128xbf16, #tpu.memory_space<vmem>>, %arg6: memref<1x128xf32, #tpu.memory_space<vmem>>, %arg7: memref<128x128xbf16, #tpu.memory_space<vmem>>, %arg8: memref<1x128xf32, #tpu.memory_space<vmem>>, %arg9: memref<128x128xbf16, #tpu.memory_space<vmem>>, %arg10: memref<1x128xf32, #tpu.memory_space<vmem>>, %arg11: memref<128x8xbf16, #tpu.memory_space<vmem>>, %arg12: memref<1x8xf32, #tpu.memory_space<vmem>>, %arg13: memref<8x8xf32, #tpu.memory_space<vmem>>) attributes {dimension_semantics = [#tpu.dimension_semantics<parallel>], iteration_bounds = array<i64: 1>, scalar_prefetch = 0 : i64, scratch_operands = 0 : i64, tpu.core_type = #tpu.core_type<tc>, window_params = [{transform_indices = @transform_0, window_bounds = array<i64: 8, 32>}, {pipeline_mode = #tpu.pipeline_mode<synchronous>, transform_indices = @transform_1, window_bounds = array<i64: 32, 384>}, {pipeline_mode = #tpu.pipeline_mode<synchronous>, transform_indices = @transform_2, window_bounds = array<i64: 128, 128>}, {pipeline_mode = #tpu.pipeline_mode<synchronous>, transform_indices = @transform_3, window_bounds = array<i64: 1, 128>}, {pipeline_mode = #tpu.pipeline_mode<synchronous>, transform_indices = @transform_4, window_bounds = array<i64: 128, 128>}, {pipeline_mode = #tpu.pipeline_mode<synchronous>, transform_indices = @transform_5, window_bounds = array<i64: 1, 128>}, {pipeline_mode = #tpu.pipeline_mode<synchronous>, transform_indices = @transform_6, window_bounds = array<i64: 128, 128>}, {pipeline_mode = #tpu.pipeline_mode<synchronous>, transform_indices = @transform_7, window_bounds = array<i64: 1, 128>}, {pipeline_mode = #tpu.pipeline_mode<synchronous>, transform_indices = @transform_8, window_bounds = array<i64: 128, 128>}, {pipeline_mode = #tpu.pipeline_mode<synchronous>, transform_indices = @transform_9, window_bounds = array<i64: 1, 128>}, {pipeline_mode = #tpu.pipeline_mode<synchronous>, transform_indices = @transform_10, window_bounds = array<i64: 128, 8>}, {pipeline_mode = #tpu.pipeline_mode<synchronous>, transform_indices = @transform_11, window_bounds = array<i64: 1, 8>}, {transform_indices = @transform_12, window_bounds = array<i64: 8, 8>}]} {
    %c0 = arith.constant 0 : index
    %c0_0 = arith.constant 0 : index
    %0 = vector.load %arg1[%c0, %c0_0] : memref<8x32xf32, #tpu.memory_space<vmem>>, vector<8x32xf32>
    %c0_1 = arith.constant 0 : index
    %c0_2 = arith.constant 0 : index
    %1 = vector.load %arg2[%c0_1, %c0_2] : memref<32x384xf32, #tpu.memory_space<vmem>>, vector<32x384xf32>
    %cst = arith.constant dense<0.000000e+00> : vector<8x384xf32>
    %2 = tpu.matmul %0, %1, %cst {dimension_numbers = #tpu.dot_dimension_numbers<[1], [0], [0], [1], [0, 0, 1, 1], [], []>} : vector<8x32xf32>, vector<32x384xf32>, vector<8x384xf32> -> vector<8x384xf32>
    %3 = vector.extract_strided_slice %2 {offsets = [0, 0], sizes = [8, 128], strides = [1, 1]} : vector<8x384xf32> to vector<8x128xf32>
    %4 = vector.extract_strided_slice %2 {offsets = [0, 128], sizes = [8, 128], strides = [1, 1]} : vector<8x384xf32> to vector<8x128xf32>
    %5 = vector.extract_strided_slice %2 {offsets = [0, 256], sizes = [8, 128], strides = [1, 1]} : vector<8x384xf32> to vector<8x128xf32>
    %6 = arith.mulf %3, %3 : vector<8x128xf32>
    %7 = arith.mulf %4, %4 : vector<8x128xf32>
    %8 = arith.addf %6, %7 : vector<8x128xf32>
    %9 = arith.mulf %5, %5 : vector<8x128xf32>
    %10 = arith.addf %8, %9 : vector<8x128xf32>
    %11 = math.sqrt %10 : vector<8x128xf32>
    %12 = arith.truncf %11 : vector<8x128xf32> to vector<8x128xbf16>
    %c0_3 = arith.constant 0 : index
    %c0_4 = arith.constant 0 : index
    %13 = vector.load %arg3[%c0_3, %c0_4] : memref<128x128xbf16, #tpu.memory_space<vmem>>, vector<128x128xbf16>
    %cst_5 = arith.constant dense<0.000000e+00> : vector<8x128xf32>
    %14 = tpu.matmul %12, %13, %cst_5 {dimension_numbers = #tpu.dot_dimension_numbers<[1], [0], [0], [1], [0, 0, 1, 1], [], []>} : vector<8x128xbf16>, vector<128x128xbf16>, vector<8x128xf32> -> vector<8x128xf32>
    %c0_6 = arith.constant 0 : index
    %c0_7 = arith.constant 0 : index
    %15 = vector.load %arg4[%c0_6, %c0_7] : memref<1x128xf32, #tpu.memory_space<vmem>>, vector<1x128xf32>
    %16 = vector.broadcast %15 : vector<1x128xf32> to vector<8x128xf32>
    %17 = arith.addf %14, %16 : vector<8x128xf32>
    %cst_8 = arith.constant 0.000000e+00 : f32
    %18 = vector.broadcast %cst_8 : f32 to vector<8x128xf32>
    %19 = arith.cmpf oge, %17, %18 : vector<8x128xf32>
    %cst_9 = arith.constant 0.00999999977 : f32
    %20 = vector.broadcast %cst_9 : f32 to vector<8x128xf32>
    %21 = arith.mulf %20, %17 : vector<8x128xf32>
    %22 = arith.select %19, %17, %21 : vector<8x128xi1>, vector<8x128xf32>
    %23 = arith.truncf %22 : vector<8x128xf32> to vector<8x128xbf16>
    %c0_10 = arith.constant 0 : index
    %c0_11 = arith.constant 0 : index
    %24 = vector.load %arg5[%c0_10, %c0_11] : memref<128x128xbf16, #tpu.memory_space<vmem>>, vector<128x128xbf16>
    %cst_12 = arith.constant dense<0.000000e+00> : vector<8x128xf32>
    %25 = tpu.matmul %23, %24, %cst_12 {dimension_numbers = #tpu.dot_dimension_numbers<[1], [0], [0], [1], [0, 0, 1, 1], [], []>} : vector<8x128xbf16>, vector<128x128xbf16>, vector<8x128xf32> -> vector<8x128xf32>
    %c0_13 = arith.constant 0 : index
    %c0_14 = arith.constant 0 : index
    %26 = vector.load %arg6[%c0_13, %c0_14] : memref<1x128xf32, #tpu.memory_space<vmem>>, vector<1x128xf32>
    %27 = vector.broadcast %26 : vector<1x128xf32> to vector<8x128xf32>
    %28 = arith.addf %25, %27 : vector<8x128xf32>
    %cst_15 = arith.constant 0.000000e+00 : f32
    %29 = vector.broadcast %cst_15 : f32 to vector<8x128xf32>
    %30 = arith.cmpf oge, %28, %29 : vector<8x128xf32>
    %cst_16 = arith.constant 0.00999999977 : f32
    %31 = vector.broadcast %cst_16 : f32 to vector<8x128xf32>
    %32 = arith.mulf %31, %28 : vector<8x128xf32>
    %33 = arith.select %30, %28, %32 : vector<8x128xi1>, vector<8x128xf32>
    %34 = arith.truncf %33 : vector<8x128xf32> to vector<8x128xbf16>
    %c0_17 = arith.constant 0 : index
    %c0_18 = arith.constant 0 : index
    %35 = vector.load %arg7[%c0_17, %c0_18] : memref<128x128xbf16, #tpu.memory_space<vmem>>, vector<128x128xbf16>
    %cst_19 = arith.constant dense<0.000000e+00> : vector<8x128xf32>
    %36 = tpu.matmul %34, %35, %cst_19 {dimension_numbers = #tpu.dot_dimension_numbers<[1], [0], [0], [1], [0, 0, 1, 1], [], []>} : vector<8x128xbf16>, vector<128x128xbf16>, vector<8x128xf32> -> vector<8x128xf32>
    %c0_20 = arith.constant 0 : index
    %c0_21 = arith.constant 0 : index
    %37 = vector.load %arg8[%c0_20, %c0_21] : memref<1x128xf32, #tpu.memory_space<vmem>>, vector<1x128xf32>
    %38 = vector.broadcast %37 : vector<1x128xf32> to vector<8x128xf32>
    %39 = arith.addf %36, %38 : vector<8x128xf32>
    %cst_22 = arith.constant 0.000000e+00 : f32
    %40 = vector.broadcast %cst_22 : f32 to vector<8x128xf32>
    %41 = arith.cmpf oge, %39, %40 : vector<8x128xf32>
    %cst_23 = arith.constant 0.00999999977 : f32
    %42 = vector.broadcast %cst_23 : f32 to vector<8x128xf32>
    %43 = arith.mulf %42, %39 : vector<8x128xf32>
    %44 = arith.select %41, %39, %43 : vector<8x128xi1>, vector<8x128xf32>
    %45 = arith.truncf %44 : vector<8x128xf32> to vector<8x128xbf16>
    %c0_24 = arith.constant 0 : index
    %c0_25 = arith.constant 0 : index
    %46 = vector.load %arg9[%c0_24, %c0_25] : memref<128x128xbf16, #tpu.memory_space<vmem>>, vector<128x128xbf16>
    %cst_26 = arith.constant dense<0.000000e+00> : vector<8x128xf32>
    %47 = tpu.matmul %45, %46, %cst_26 {dimension_numbers = #tpu.dot_dimension_numbers<[1], [0], [0], [1], [0, 0, 1, 1], [], []>} : vector<8x128xbf16>, vector<128x128xbf16>, vector<8x128xf32> -> vector<8x128xf32>
    %c0_27 = arith.constant 0 : index
    %c0_28 = arith.constant 0 : index
    %48 = vector.load %arg10[%c0_27, %c0_28] : memref<1x128xf32, #tpu.memory_space<vmem>>, vector<1x128xf32>
    %49 = vector.broadcast %48 : vector<1x128xf32> to vector<8x128xf32>
    %50 = arith.addf %47, %49 : vector<8x128xf32>
    %cst_29 = arith.constant 0.000000e+00 : f32
    %51 = vector.broadcast %cst_29 : f32 to vector<8x128xf32>
    %52 = arith.cmpf oge, %50, %51 : vector<8x128xf32>
    %cst_30 = arith.constant 0.00999999977 : f32
    %53 = vector.broadcast %cst_30 : f32 to vector<8x128xf32>
    %54 = arith.mulf %53, %50 : vector<8x128xf32>
    %55 = arith.select %52, %50, %54 : vector<8x128xi1>, vector<8x128xf32>
    %56 = arith.truncf %55 : vector<8x128xf32> to vector<8x128xbf16>
    %c0_31 = arith.constant 0 : index
    %c0_32 = arith.constant 0 : index
    %57 = vector.load %arg11[%c0_31, %c0_32] : memref<128x8xbf16, #tpu.memory_space<vmem>>, vector<128x8xbf16>
    %cst_33 = arith.constant dense<0.000000e+00> : vector<8x8xf32>
    %58 = tpu.matmul %56, %57, %cst_33 {dimension_numbers = #tpu.dot_dimension_numbers<[1], [0], [0], [1], [0, 0, 1, 1], [], []>} : vector<8x128xbf16>, vector<128x8xbf16>, vector<8x8xf32> -> vector<8x8xf32>
    %c0_34 = arith.constant 0 : index
    %c0_35 = arith.constant 0 : index
    %59 = vector.load %arg12[%c0_34, %c0_35] : memref<1x8xf32, #tpu.memory_space<vmem>>, vector<1x8xf32>
    %60 = vector.broadcast %59 : vector<1x8xf32> to vector<8x8xf32>
    %61 = arith.addf %58, %60 : vector<8x8xf32>
    %c0_36 = arith.constant 0 : index
    %c0_37 = arith.constant 0 : index
    %62 = vector.load %arg13[%c0_36, %c0_37] : memref<8x8xf32, #tpu.memory_space<vmem>>, vector<8x8xf32>
    tpu.vector_store %arg13[%c0_36, %c0_37], %61 {strides = array<i32>} : memref<8x8xf32, #tpu.memory_space<vmem>>, vector<8x8xf32>,
    return
  }
  func.func @transform_0(%arg0: i32) -> (i32, i32) {
    %c0_i32 = arith.constant 0 : i32
    %c0_i32_0 = arith.constant 0 : i32
    return %arg0, %c0_i32 : i32, i32
  }
  func.func @transform_1(%arg0: i32) -> (i32, i32) {
    %c0_i32 = arith.constant 0 : i32
    %c0_i32_0 = arith.constant 0 : i32
    %c0_i32_1 = arith.constant 0 : i32
    return %c0_i32, %c0_i32_0 : i32, i32
  }
  func.func @transform_2(%arg0: i32) -> (i32, i32) {
    %c0_i32 = arith.constant 0 : i32
    %c0_i32_0 = arith.constant 0 : i32
    %c0_i32_1 = arith.constant 0 : i32
    return %c0_i32, %c0_i32_0 : i32, i32
  }
  func.func @transform_3(%arg0: i32) -> (i32, i32) {
    %c0_i32 = arith.constant 0 : i32
    %c0_i32_0 = arith.constant 0 : i32
    %c0_i32_1 = arith.constant 0 : i32
    return %c0_i32, %c0_i32_0 : i32, i32
  }
  func.func @transform_4(%arg0: i32) -> (i32, i32) {
    %c0_i32 = arith.constant 0 : i32
    %c0_i32_0 = arith.constant 0 : i32
    %c0_i32_1 = arith.constant 0 : i32
    return %c0_i32, %c0_i32_0 : i32, i32
  }
  func.func @transform_5(%arg0: i32) -> (i32, i32) {
    %c0_i32 = arith.constant 0 : i32
    %c0_i32_0 = arith.constant 0 : i32
    %c0_i32_1 = arith.constant 0 : i32
    return %c0_i32, %c0_i32_0 : i32, i32
  }
  func.func @transform_6(%arg0: i32) -> (i32, i32) {
    %c0_i32 = arith.constant 0 : i32
    %c0_i32_0 = arith.constant 0 : i32
    %c0_i32_1 = arith.constant 0 : i32
    return %c0_i32, %c0_i32_0 : i32, i32
  }
  func.func @transform_7(%arg0: i32) -> (i32, i32) {
    %c0_i32 = arith.constant 0 : i32
    %c0_i32_0 = arith.constant 0 : i32
    %c0_i32_1 = arith.constant 0 : i32
    return %c0_i32, %c0_i32_0 : i32, i32
  }
  func.func @transform_8(%arg0: i32) -> (i32, i32) {
    %c0_i32 = arith.constant 0 : i32
    %c0_i32_0 = arith.constant 0 : i32
    %c0_i32_1 = arith.constant 0 : i32
    return %c0_i32, %c0_i32_0 : i32, i32
  }
  func.func @transform_9(%arg0: i32) -> (i32, i32) {
    %c0_i32 = arith.constant 0 : i32
    %c0_i32_0 = arith.constant 0 : i32
    %c0_i32_1 = arith.constant 0 : i32
    return %c0_i32, %c0_i32_0 : i32, i32
  }
  func.func @transform_10(%arg0: i32) -> (i32, i32) {
    %c0_i32 = arith.constant 0 : i32
    %c0_i32_0 = arith.constant 0 : i32
    %c0_i32_1 = arith.constant 0 : i32
    return %c0_i32, %c0_i32_0 : i32, i32
  }
  func.func @transform_11(%arg0: i32) -> (i32, i32) {
    %c0_i32 = arith.constant 0 : i32
    %c0_i32_0 = arith.constant 0 : i32
    %c0_i32_1 = arith.constant 0 : i32
    return %c0_i32, %c0_i32_0 : i32, i32
  }
  func.func @transform_12(%arg0: i32) -> (i32, i32) {
    %c0_i32 = arith.constant 0 : i32
    %c0_i32_0 = arith.constant 0 : i32
    return %arg0, %c0_i32 : i32, i32
  }
}

</mosaic_0001>

<bundles_post_ra>
// kernel: predict_net_forward.1
= control target key start
LH: loop header
LB: loop body
LE: loop exit
PB: predicated region body
PF: predicated region fallthrough
CT: control target
= control target key end

     0   :  { %v1057_v3 = vmov 0.0   ;;  %vm1058_vm0 = vmmov 0   ;;  %vm55_vm1 = vcmask 261120   ;;  %v1059_v20 = vmov 0.0|0.0   ;;  %s1357_s1 = inlined_call_operand.vmem [shape: f32[32,384], index: 1, kind: input, shape index: {}]   ;;  %s1358_s2 = inlined_call_operand.vmem [shape: bf16[128,128], index: 2, kind: input, shape index: {}]   ;;  %s1359_s0 = inlined_call_operand.vmem [shape: f32[8,32], index: 0, kind: input, shape index: {}]   ;;  %s1360_s4 = inlined_call_operand.vmem [shape: bf16[128,128], index: 4, kind: input, shape index: {}]   ;;  %s1361_s6 = inlined_call_operand.vmem [shape: bf16[128,128], index: 6, kind: input, shape index: {}]   ;;  %s1362_s3 = inlined_call_operand.vmem [shape: f32[1,128], index: 3, kind: input, shape index: {}]   ;;  %s1363_s8 = inlined_call_operand.vmem [shape: bf16[128,128], index: 8, kind: input, shape index: {}]   ;;  %s1364_s5 = inlined_call_operand.vmem [shape: f32[1,128], index: 5, kind: input, shape index: {}]   ;;  %s1365_s10 = inlined_call_operand.vmem [shape: bf16[128,8], index: 10, kind: input, shape index: {}]   ;;  %s1366_s7 = inlined_call_operand.vmem [shape: f32[1,128], index: 7, kind: input, shape index: {}]   ;;  %s1367_s9 = inlined_call_operand.vmem [shape: f32[1,128], index: 9, kind: input, shape index: {}]   ;;  %s1368_s11 = inlined_call_operand.vmem [shape: f32[1,8], index: 11, kind: input, shape index: {}]   ;;  %s1369_s12 = inlined_call_operand.vmem [shape: f32[8,8], index: 12, kind: output, shape index: {}]  }
   0x1   :  { %v44_v0 = vld [vmem:[%s1357_s1 + $0x8] sm:$0xff]  ;;  %v47_v1 = vld [vmem:[%s1357_s1 + $0x20] sm:$0xff]  ;;  %123 = vmatprep.mubr.f32.mxu1 %v1057_v3  ;;  %898 = vmatprep.subr.bf16.mxu0 %v1057_v3  ;;  %v46_v5 = vld [vmem:[%s1357_s1 + $0x18] sm:$0xff]  ;;  %vm784_vm8 = vcmask 64512  }
   0x2   :  { %v43_v2 = vld [vmem:[%s1357_s1] sm:$0xff]  ;;  %v998_v4 = vpack.c.bf16 %v47_v1, %v44_v0  ;;  %v50_v6 = vld [vmem:[%s1357_s1 + $0x38] sm:$0xff]  ;;  %v53_v7 = vld [vmem:[%s1357_s1 + $0x50] sm:$0xff]  ;;  %914 = vmatprep.mubr.msk.bf16.mxu0 %vm1058_vm0, %v1057_v3 }
   0x3   :  { %v1000_v8 = vpack.c.bf16 %v46_v5, %v43_v2  ;;  %v1002_v9 = vpack.c.bf16 %v53_v7, %v50_v6  ;;  %v49_v10 = vld [vmem:[%s1357_s1 + $0x30] sm:$0xff]  ;;  %v52_v11 = vld [vmem:[%s1357_s1 + $0x48] sm:$0xff]  ;;  %v1015_v15 = vld [vmem:[%s1358_s2] sm:$0xff]  }
   0x4   :  { %999 = vmatprep.subr.bf16.mxu1 %v998_v4  ;;  %v45_v12 = vld [vmem:[%s1357_s1 + $0x10] sm:$0xff]  ;;  %v1004_v13 = vpack.c.bf16 %v52_v11, %v49_v10  ;;  %v48_v14 = vld [vmem:[%s1357_s1 + $0x28] sm:$0xff]  ;;  %v42_v16 = vld [vmem:[%s1359_s0] sm:$0xff]  ;;  %899 = vmatpush3.bf16.msra.mxu0 %v1015_v15 }
   0x5   :  { %1001 = vmatpush1.bf16.msra.mxu1 %v1000_v8  ;;  %v51_v17 = vld [vmem:[%s1357_s1 + $0x40] sm:$0xff]  ;;  %v54_v18 = vld [vmem:[%s1357_s1 + $0x58] sm:$0xff]  ;;  %v1007_v19 = vpack.c.bf16 %v48_v14, %v45_v12  ;;  %900 = vmatprep.subr.bf16.mxu0 %v1057_v3  ;;  %v1016_v22 = vld [vmem:[%s1358_s2 + $0x8] sm:$0xff]  }
   0x6   :  { %1003 = vmatprep.subr.bf16.mxu1 %v1002_v9  ;;  %v1010_v21 = vpack.c.bf16 %v54_v18, %v51_v17  ;;  %v1017_v23 = vld [vmem:[%s1358_s2 + $0x10] sm:$0xff]   ;;  %v1018_v24 = vld [vmem:[%s1358_s2 + $0x18] sm:$0xff]   ;;  %v1019_v25 = vld [vmem:[%s1358_s2 + $0x20] sm:$0xff]  }
   0x7   :  { %v1020_v26 = vld [vmem:[%s1358_s2 + $0x28] sm:$0xff]   ;;  %v1021_v27 = vld [vmem:[%s1358_s2 + $0x30] sm:$0xff]   ;;  %v1022_v28 = vld [vmem:[%s1358_s2 + $0x38] sm:$0xff]  }
   0x8   :  { %901 = vmatpush3.bf16.msra.mxu0 %v1016_v22  ;;  %v1023_v29 = vld [vmem:[%s1360_s4] sm:$0xff]   ;;  %v1024_v30 = vld [vmem:[%s1360_s4 + $0x8] sm:$0xff]   ;;  %v1025_v31 = vld [vmem:[%s1360_s4 + $0x10] sm:$0xff]  }
   0x9   :  { %1005 = vmatpush1.bf16.msra.mxu1 %v1004_v13  ;;  %902 = vmatprep.subr.bf16.mxu0 %v1057_v3  ;;  %v1026_v32 = vld [vmem:[%s1360_s4 + $0x18] sm:$0xff]   ;;  %v1027_v33 = vld [vmem:[%s1360_s4 + $0x20] sm:$0xff]   ;;  %v1028_v34 = vld [vmem:[%s1360_s4 + $0x28] sm:$0xff]  }
   0xa   :  { %1006 = vmatprep.subr.bf16.mxu1 %v1059_v20  ;;  %v1029_v50 = vld [vmem:[%s1360_s4 + $0x30] sm:$0xff]   ;;  %v1030_v51 = vld [vmem:[%s1360_s4 + $0x38] sm:$0xff]   ;;  %v1031_v52 = vld [vmem:[%s1361_s6] sm:$0xff]  }
   0xb   :  { %v1032_v53 = vld [vmem:[%s1361_s6 + $0x8] sm:$0xff]   ;;  %v1033_v54 = vld [vmem:[%s1361_s6 + $0x10] sm:$0xff]   ;;  %v1034_v55 = vld [vmem:[%s1361_s6 + $0x18] sm:$0xff]  }
   0xc   :  { %790 = vmatmul.mubr.msk.f32.vlgmr.msra.gmra.mrb[0].mxu1 %vm55_vm1, %v42_v16  ;;  %903 = vmatpush3.bf16.msra.mxu0 %v1017_v23  ;;  %v1035_v56 = vld [vmem:[%s1361_s6 + $0x20] sm:$0xff]   ;;  %v1036_v57 = vld [vmem:[%s1361_s6 + $0x28] sm:$0xff]   ;;  %v1037_v4 = vld [vmem:[%s1361_s6 + $0x30] sm:$0xff]  }
   0xd   :  { %1008 = vmatpush3.bf16.msra.mxu1 %v1007_v19  ;;  %895 = vmatprep.mubr.msk.f32.mxu1 %vm1058_vm0, %v1057_v3  ;;  %v792_v58 = vld [vmem:[%s1362_s3] ss:$0 sm:$0xff]  ;;  %v1038_v5 = vld [vmem:[%s1361_s6 + $0x38] sm:$0xff]   ;;  %v1040_v7 = vld [vmem:[%s1363_s8 + $0x8] sm:$0xff]  }
   0xe   :  { %1009 = vmatprep.subr.bf16.mxu1 %v1059_v20  ;;  %904 = vmatprep.subr.bf16.mxu0 %v1057_v3  ;;  %v1039_v6 = vld [vmem:[%s1363_s8] sm:$0xff]   ;;  %v1041_v8 = vld [vmem:[%s1363_s8 + $0x10] sm:$0xff]   ;;  %v1042_v9 = vld [vmem:[%s1363_s8 + $0x18] sm:$0xff]  }
   0xf   :  { %v1043_v10 = vld [vmem:[%s1363_s8 + $0x20] sm:$0xff]   ;;  %v1044_v11 = vld [vmem:[%s1363_s8 + $0x28] sm:$0xff]   ;;  %v1046_v22 = vld [vmem:[%s1363_s8 + $0x38] sm:$0xff]  }
  0x10   :  { %905 = vmatpush3.bf16.msra.mxu0 %v1018_v24  ;;  %v801_v12 = vld [vmem:[%s1364_s5] ss:$0 sm:$0xff]  ;;  %v1048_v24 = vld [vmem:[%s1365_s10 + $0x8] sm:$0xff]  }
  0x11   :  { %1011 = vmatpush3.bf16.msra.mxu1 %v1010_v21  ;;  %906 = vmatprep.subr.bf16.mxu0 %v1057_v3  ;;  %v1045_v21 = vld [vmem:[%s1363_s8 + $0x30] sm:$0xff]   ;;  %v1047_v23 = vld [vmem:[%s1365_s10] sm:$0xff]  }
  0x12   :  { %918 = vmatprep.subr.bf16.mxu1 %v1057_v3 }
  0x14   :  { %896 = vmatmul.mubr.msk.f32.vlgmr.msra.gmra.mrb[2].mxu1 %vm55_vm1, %v42_v16  ;;  %907 = vmatpush3.bf16.msra.mxu0 %v1019_v25  ;;  %v1049_v25 = vld [vmem:[%s1365_s10 + $0x10] sm:$0xff]  }
  0x15   :  { %934 = vmatprep.mubr.msk.bf16.mxu1 %vm1058_vm0, %v1057_v3  ;;  %908 = vmatprep.subr.bf16.mxu0 %v1057_v3 }
  0x16   :  { %919 = vmatpush3.bf16.msra.mxu1 %v1023_v29  ;;  %v810_v29 = vld [vmem:[%s1366_s7] ss:$0 sm:$0xff] }
  0x17   :  { %920 = vmatprep.subr.bf16.mxu1 %v1057_v3 }
  0x18   :  { %909 = vmatpush3.bf16.msra.mxu0 %v1020_v26  ;;  %v1050_v26 = vld [vmem:[%s1365_s10 + $0x18] sm:$0xff]  }
  0x19   :  { %910 = vmatprep.subr.bf16.mxu0 %v1057_v3 }
  0x1a   :  { %921 = vmatpush3.bf16.msra.mxu1 %v1024_v30 }
  0x1b   :  { %922 = vmatprep.subr.bf16.mxu1 %v1057_v3 }
  0x1c   :  { %911 = vmatpush3.bf16.msra.mxu0 %v1021_v27  ;;  %v1051_v27 = vld [vmem:[%s1365_s10 + $0x20] sm:$0xff]  }
  0x1d   :  { %912 = vmatprep.subr.bf16.mxu0 %v1057_v3 }
  0x1e   :  { %923 = vmatpush3.bf16.msra.mxu1 %v1025_v31 }
  0x1f   :  { %924 = vmatprep.subr.bf16.mxu1 %v1057_v3 }
  0x20   :  { %913 = vmatpush3.bf16.msra.mxu0 %v1022_v28  ;;  %v1052_v28 = vld [vmem:[%s1365_s10 + $0x28] sm:$0xff]  }
  0x21   :  { %938 = vmatprep.subr.bf16.mxu0 %v1057_v3 }
  0x22   :  { %925 = vmatpush3.bf16.msra.mxu1 %v1026_v32 }
  0x23   :  { %926 = vmatprep.subr.bf16.mxu1 %v1057_v3 }
  0x26   :  { %927 = vmatpush3.bf16.msra.mxu1 %v1027_v33 }
  0x27   :  { %928 = vmatprep.subr.bf16.mxu1 %v1057_v3 }
  0x2a   :  { %929 = vmatpush3.bf16.msra.mxu1 %v1028_v34 }
  0x2b   :  { %930 = vmatprep.subr.bf16.mxu1 %v1057_v3 }
  0x2e   :  { %931 = vmatpush3.bf16.msra.mxu1 %v1029_v50 }
  0x2f   :  { %932 = vmatprep.subr.bf16.mxu1 %v1057_v3 }
  0x32   :  { %933 = vmatpush3.bf16.msra.mxu1 %v1030_v51 }
  0x33   :  { %958 = vmatprep.subr.bf16.mxu1 %v1057_v3 }
  0xdf   :  { %v125_v35 = vpop.f32.mrb[0].mxu1 }
  0xe0   :  { %v200_v36 = vmul.f32 %v125_v35, %v125_v35  ;;  %v127_v37 = vpop.f32.mrb[1].mxu1 }
  0xe1   :  { %v201_v38 = vmul.f32 %v127_v37, %v127_v37 }
  0xe3   :  { %v202_v39 = vadd.f32 %v201_v38, %v200_v36  ;;  %v1053_v38 = vld [vmem:[%s1365_s10 + $0x30] sm:$0xff]  }
  0xe7   :  { %v196_v40 = vpop.f32.mrb[2].mxu1 }
  0xe8   :  { %v203_v41 = vmul.f32 %v196_v40, %v196_v40  ;;  %v897_v42 = vpop.f32.mrb[3].mxu1  ;;  %v819_v40 = vld [vmem:[%s1367_s9] ss:$0 sm:$0xff] }
  0xea   :  { %v204_v43 = vadd.f32 %v203_v41, %v202_v39  ;;  %v1054_v39 = vld [vmem:[%s1365_s10 + $0x38] sm:$0xff]  }
  0xec   :  { %1055 = vrsqrt.f32 %v204_v43  ;;  %vm207_vm2 = vcmp.eq.f32.partialorder %v204_v43, inf  ;;  %v210_v46 = vand.u32 2147483648, %v204_v43  ;;  %vm209_vm3 = vcmp.eq.f32.partialorder %v204_v43, 0.0 }
  0xf6   :  { %v1056_v44 = vpop.eup %1055 }
  0xf7   :  { %v206_v45 = vmul.f32 %v1056_v44, %v204_v43 }
  0xf9   :  { %v208_v47 = vsel %vm207_vm2, %v204_v43, %v206_v45 }
  0xfa   :  { %v211_v48 = vsel %vm209_vm3, %v210_v46, %v208_v47 }
  0xfb   :  { %v212_v49 = vpack.c.bf16 %v211_v48, %v211_v48 }
  0xfd   :  { %915 = vmatmul.mubr.bf16.vlgmr.msra.gmra.mrb[0].mxu0 %v212_v49 }
  0xfe   :  { %954 = vmatprep.mubr.msk.bf16.mxu0 %vm1058_vm0, %v1057_v3  ;;  %939 = vmatpush3.bf16.msra.mxu0 %v1031_v52 }
  0xff   :  { %940 = vmatprep.subr.bf16.mxu0 %v1057_v3 }
 0x102   :  { %941 = vmatpush3.bf16.msra.mxu0 %v1032_v53 }
 0x103   :  { %942 = vmatprep.subr.bf16.mxu0 %v1057_v3 }
 0x106   :  { %943 = vmatpush3.bf16.msra.mxu0 %v1033_v54 }
 0x107   :  { %944 = vmatprep.subr.bf16.mxu0 %v1057_v3 }
 0x10a   :  { %945 = vmatpush3.bf16.msra.mxu0 %v1034_v55 }
 0x10b   :  { %946 = vmatprep.subr.bf16.mxu0 %v1057_v3 }
 0x10e   :  { %947 = vmatpush3.bf16.msra.mxu0 %v1035_v56 }
 0x10f   :  { %948 = vmatprep.subr.bf16.mxu0 %v1057_v3 }
 0x112   :  { %949 = vmatpush3.bf16.msra.mxu0 %v1036_v57 }
 0x113   :  { %950 = vmatprep.subr.bf16.mxu0 %v1057_v3 }
 0x116   :  { %951 = vmatpush3.bf16.msra.mxu0 %v1037_v4 }
 0x117   :  { %952 = vmatprep.subr.bf16.mxu0 %v1057_v3 }
 0x11a   :  { %953 = vmatpush3.bf16.msra.mxu0 %v1038_v5 }
 0x11b   :  { %978 = vmatprep.subr.bf16.mxu0 %v1057_v3 }
 0x1d0   :  { %v318_v59 = vpop.f32.mrb[0].mxu0 }
 0x1d1   :  { %v319_v60 = vadd.f32 %v792_v58, %v318_v59  ;;  %v916_v61 = vpop.f32.mrb[1].mxu0 }
 0x1d2   :  { %v321_v62 = vpop.f32.mrb[2].mxu0 }
 0x1d3   :  { %vm324_vm4 = vcmp.ge.f32.partialorder %v319_v60, 0.0  ;;  %v325_v63 = vmul.f32 0.01, %v319_v60  ;;  %v917_v0 = vpop.f32.mrb[3].mxu0 }
 0x1d5   :  { %v326_v1 = vsel %vm324_vm4, %v319_v60, %v325_v63 }
 0x1d6   :  { %v327_v2 = vpack.c.bf16 %v326_v1, %v326_v1 }
 0x1d8   :  { %935 = vmatmul.mubr.bf16.vlgmr.msra.gmra.mrb[4].mxu1 %v327_v2 }
 0x1d9   :  { %974 = vmatprep.mubr.msk.bf16.mxu1 %vm1058_vm0, %v1057_v3  ;;  %959 = vmatpush3.bf16.msra.mxu1 %v1039_v6 }
 0x1da   :  { %960 = vmatprep.subr.bf16.mxu1 %v1057_v3 }
 0x1dd   :  { %961 = vmatpush3.bf16.msra.mxu1 %v1040_v7 }
 0x1de   :  { %962 = vmatprep.subr.bf16.mxu1 %v1057_v3 }
 0x1e1   :  { %963 = vmatpush3.bf16.msra.mxu1 %v1041_v8 }
 0x1e2   :  { %964 = vmatprep.subr.bf16.mxu1 %v1057_v3 }
 0x1e5   :  { %965 = vmatpush3.bf16.msra.mxu1 %v1042_v9 }
 0x1e6   :  { %966 = vmatprep.subr.bf16.mxu1 %v1057_v3 }
 0x1e9   :  { %967 = vmatpush3.bf16.msra.mxu1 %v1043_v10 }
 0x1ea   :  { %968 = vmatprep.subr.bf16.mxu1 %v1057_v3 }
 0x1ed   :  { %969 = vmatpush3.bf16.msra.mxu1 %v1044_v11 }
 0x1ee   :  { %970 = vmatprep.subr.bf16.mxu1 %v1057_v3 }
 0x1f1   :  { %971 = vmatpush3.bf16.msra.mxu1 %v1045_v21 }
 0x1f2   :  { %972 = vmatprep.subr.bf16.mxu1 %v1057_v3 }
 0x1f5   :  { %973 = vmatpush3.bf16.msra.mxu1 %v1046_v22 }
 0x2ab   :  { %v433_v13 = vpop.f32.mrb[4].mxu1 }
 0x2ac   :  { %v434_v14 = vadd.f32 %v801_v12, %v433_v13  ;;  %v936_v15 = vpop.f32.mrb[5].mxu1 }
 0x2ad   :  { %v436_v16 = vpop.f32.mrb[6].mxu1 }
 0x2ae   :  { %vm439_vm5 = vcmp.ge.f32.partialorder %v434_v14, 0.0  ;;  %v440_v17 = vmul.f32 0.01, %v434_v14  ;;  %v937_v18 = vpop.f32.mrb[7].mxu1 }
 0x2b0   :  { %v441_v19 = vsel %vm439_vm5, %v434_v14, %v440_v17 }
 0x2b1   :  { %v442_v20 = vpack.c.bf16 %v441_v19, %v441_v19 }
 0x2b3   :  { %955 = vmatmul.mubr.bf16.vlgmr.msra.gmra.mrb[4].mxu0 %v442_v20 }
 0x2b4   :  { %994 = vmatprep.mubr.msk.bf16.mxu0 %vm1058_vm0, %v1057_v3  ;;  %979 = vmatpush3.bf16.msra.mxu0 %v1047_v23 }
 0x2b5   :  { %980 = vmatprep.subr.bf16.mxu0 %v1057_v3 }
 0x2b8   :  { %981 = vmatpush3.bf16.msra.mxu0 %v1048_v24 }
 0x2b9   :  { %982 = vmatprep.subr.bf16.mxu0 %v1057_v3 }
 0x2bc   :  { %983 = vmatpush3.bf16.msra.mxu0 %v1049_v25 }
 0x2bd   :  { %984 = vmatprep.subr.bf16.mxu0 %v1057_v3 }
 0x2c0   :  { %985 = vmatpush3.bf16.msra.mxu0 %v1050_v26 }
 0x2c1   :  { %986 = vmatprep.subr.bf16.mxu0 %v1057_v3 }
 0x2c4   :  { %987 = vmatpush3.bf16.msra.mxu0 %v1051_v27 }
 0x2c5   :  { %988 = vmatprep.subr.bf16.mxu0 %v1057_v3 }
 0x2c8   :  { %989 = vmatpush3.bf16.msra.mxu0 %v1052_v28 }
 0x2c9   :  { %990 = vmatprep.subr.bf16.mxu0 %v1057_v3 }
 0x2cc   :  { %991 = vmatpush3.bf16.msra.mxu0 %v1053_v38 }
 0x2cd   :  { %992 = vmatprep.subr.bf16.mxu0 %v1057_v3  ;;  %v828_v3 = vld [vmem:[%s1368_s11] ss:$0 sm:$0xff] }
 0x2d0   :  { %993 = vmatpush3.bf16.msra.mxu0 %v1054_v39 }
 0x386   :  { %v548_v30 = vpop.f32.mrb[4].mxu0 }
 0x387   :  { %v549_v31 = vadd.f32 %v810_v29, %v548_v30  ;;  %v956_v32 = vpop.f32.mrb[5].mxu0 }
 0x388   :  { %v551_v33 = vpop.f32.mrb[6].mxu0 }
 0x389   :  { %vm554_vm6 = vcmp.ge.f32.partialorder %v549_v31, 0.0  ;;  %v555_v34 = vmul.f32 0.01, %v549_v31  ;;  %v957_v35 = vpop.f32.mrb[7].mxu0 }
 0x38b   :  { %v556_v36 = vsel %vm554_vm6, %v549_v31, %v555_v34 }
 0x38c   :  { %v557_v37 = vpack.c.bf16 %v556_v36, %v556_v36 }
 0x38e   :  { %975 = vmatmul.mubr.bf16.vlgmr.msra.gmra.mrb[8].mxu1 %v557_v37 }
 0x461   :  { %v663_v41 = vpop.f32.mrb[8].mxu1 }
 0x462   :  { %v664_v42 = vadd.f32 %v819_v40, %v663_v41  ;;  %v976_v43 = vpop.f32.mrb[9].mxu1 }
 0x463   :  { %v666_v44 = vpop.f32.mrb[10].mxu1 }
 0x464   :  { %vm669_vm7 = vcmp.ge.f32.partialorder %v664_v42, 0.0  ;;  %v670_v45 = vmul.f32 0.01, %v664_v42  ;;  %v977_v46 = vpop.f32.mrb[11].mxu1 }
 0x466   :  { %v671_v47 = vsel %vm669_vm7, %v664_v42, %v670_v45 }
 0x467   :  { %v672_v48 = vpack.c.bf16 %v671_v47, %v671_v47 }
 0x469   :  { %995 = vmatmul.mubr.bf16.vlgmr.msra.gmra.mrb[8].mxu0 %v672_v48 }
 0x53c   :  { %v778_v49 = vpop.f32.mrb[8].mxu0 }
 0x53d   :  { %v779_v50 = vadd.f32 %v828_v3, %v778_v49  ;;  %v996_v51 = vpop.f32.mrb[9].mxu0 }
 0x53e   :  { %v781_v52 = vpop.f32.mrb[10].mxu0 }
 0x53f   :  { %785 = vst.msk [vmem:[%s1369_s12] sm:$0xff] %vm784_vm8, %v779_v50  ;;  %v997_v53 = vpop.f32.mrb[11].mxu0 }

</bundles_post_ra>
